<compile_context>
chip_gen: v5e
topology: v5e:2x2
jax: 0.10.0
libtpu: 0.0.40
codegen_flags: <defaults>
</compile_context>

<pallas_src>
import jax
import jax.numpy as jnp
from jax.experimental import pallas as pl
from jax.experimental.pallas import tpu as pltpu

LN_EPS = 1e-5


def gcn_kernel(a_ref, hsrc_ref, hres_ref, wt_ref, gamma_ref, beta_ref,
               out_ref, acc_ref):
    # a_ref:     (TN, TK) bf16  adjacency block  A[dst_tile, src_tile]
    # hsrc_ref:  (TK, D)  bf16  source-node features for this k-tile
    # hres_ref:  (TN, D)  f32   this dst-tile's own features (residual)
    # wt_ref:    (D, D)   bf16  pre-transposed Linear weight (W^T)
    # gamma_ref: (1, D)   f32   LayerNorm weight
    # beta_ref:  (1, D)   f32   LayerNorm bias
    # out_ref:   (TN, D)        output tile (resident across the k axis)
    # acc_ref:   (TN, D)  f32   VMEM accumulator for u = A @ h
    k = pl.program_id(1)

    @pl.when(k == 0)
    def _():
        acc_ref[...] = jnp.zeros_like(acc_ref)

    # Partial neighborhood aggregation on the MXU (bf16 in, f32 accumulate).
    acc_ref[...] += jnp.dot(a_ref[...], hsrc_ref[...],
                            preferred_element_type=jnp.float32)

    @pl.when(k == pl.num_programs(1) - 1)
    def _():
        u = acc_ref[...]                                          # (TN, D) f32

        # Linear (bias=False): u @ W^T, weight already transposed outside.
        lin = jnp.dot(u.astype(jnp.bfloat16), wt_ref[...],
                      preferred_element_type=jnp.float32)         # (TN, D)

        # ReLU + residual (f32, VPU)
        z = jnp.maximum(lin, 0.0) + hres_ref[...]

        # LayerNorm over last dim (biased variance, eps=1e-5), affine, all f32.
        mean = jnp.mean(z, axis=-1, keepdims=True)                # XLU reduce
        zc = z - mean
        var = jnp.mean(zc * zc, axis=-1, keepdims=True)           # XLU reduce
        inv = jax.lax.rsqrt(var + LN_EPS)                         # EUP
        scale = inv * gamma_ref[...]                              # fold scale
        out = zc * scale + beta_ref[...]

        # TODO(synk): dropout(p=0.2) is identity at inference (training=False);
        # training-mode dropout would use pltpu.prng_seed / stateful_bernoulli.
        out_ref[...] = out.astype(out_ref.dtype)


def graph_convolution(adj, h, w, gamma, beta, *, tile_n=256, tile_k=256):
    """adj: (N, N) f32 0/1, h: (N, D), w: (D, D) [out,in], gamma/beta: (D,) -> (N, D)."""
    N, D = h.shape
    tile_n = min(tile_n, N)
    tile_k = min(tile_k, N)
    assert N % tile_n == 0 and N % tile_k == 0, "N must be divisible by tile sizes"

    # One-time host/XLA-side prep (hoisted out of the kernel):
    adj_bf16 = adj.astype(jnp.bfloat16)        # 0/1 values: exact in bf16
    h_bf16 = h.astype(jnp.bfloat16)            # MXU operand for aggregation
    wt_bf16 = w.T.astype(jnp.bfloat16)         # pre-transposed Linear weight
    gamma2 = gamma.reshape(1, D).astype(jnp.float32)
    beta2 = beta.reshape(1, D).astype(jnp.float32)

    grid = (N // tile_n, N // tile_k)          # (dst tiles, src/K tiles)

    # Advisory cost estimate so XLA schedules sensibly around the custom call.
    cost = pl.CostEstimate(
        flops=2 * N * N * D + 2 * N * D * D,          # aggregation + linear
        transcendentals=N,                            # one rsqrt per row
        bytes_accessed=(N * N * 2                     # adjacency (bf16)
                        + (N // tile_n) * N * D * 2   # h_src streamed per dst-tile
                        + N * D * 4                   # residual (f32)
                        + D * D * 2                   # W^T (bf16, resident)
                        + N * D * 4),                 # output (f32)
    )

    return pl.pallas_call(
        gcn_kernel,
        out_shape=jax.ShapeDtypeStruct((N, D), h.dtype),
        grid_spec=pltpu.PrefetchScalarGridSpec(
            num_scalar_prefetch=0,
            grid=grid,
            in_specs=[
                # Adjacency block: the only large per-step-varying HBM stream.
                pl.BlockSpec((tile_n, tile_k), lambda i, k: (i, k)),
                # Source-node features for this k-tile (bf16).
                pl.BlockSpec((tile_k, D), lambda i, k: (k, 0)),
                # Residual tile (f32) — constant across k -> VMEM-resident.
                pl.BlockSpec((tile_n, D), lambda i, k: (i, 0)),
                # Constant-index blocks stay VMEM-resident across the grid.
                pl.BlockSpec((D, D), lambda i, k: (0, 0)),      # W^T
                pl.BlockSpec((1, D), lambda i, k: (0, 0)),      # LN gamma
                pl.BlockSpec((1, D), lambda i, k: (0, 0)),      # LN beta
            ],
            out_specs=pl.BlockSpec((tile_n, D), lambda i, k: (i, 0)),
            scratch_shapes=[pltpu.VMEM((tile_n, D), jnp.float32)],
        ),
        compiler_params=pltpu.CompilerParams(
            dimension_semantics=("parallel", "arbitrary")),
        cost_estimate=cost,
    )(adj_bf16, h_bf16, h, wt_bf16, gamma2, beta2)


def reference_matched(adj, h, w, gamma, beta):
    """Reference with the same bf16-operand / f32-accumulate matmul numerics."""
    u = jnp.dot(adj.astype(jnp.bfloat16), h.astype(jnp.bfloat16),
                preferred_element_type=jnp.float32)
    lin = jnp.dot(u.astype(jnp.bfloat16), w.T.astype(jnp.bfloat16),
                  preferred_element_type=jnp.float32)
    z = jnp.maximum(lin, 0.0) + h
    mean = jnp.mean(z, axis=-1, keepdims=True)
    var = jnp.mean((z - mean) ** 2, axis=-1, keepdims=True)
    return (z - mean) * jax.lax.rsqrt(var + LN_EPS) * gamma + beta


def reference_f32(adj, h, w, gamma, beta):
    """Full-precision reference (matches the PyTorch module numerics)."""
    u = adj @ h
    z = jnp.maximum(u @ w.T, 0.0) + h
    mean = jnp.mean(z, axis=-1, keepdims=True)
    var = jnp.mean((z - mean) ** 2, axis=-1, keepdims=True)
    return (z - mean) * jax.lax.rsqrt(var + LN_EPS) * gamma + beta


if __name__ == "__main__":
    N, D = 256, 128  # 256 nodes, hidden_dim = 128
    key = jax.random.PRNGKey(0)
    k_h, k_w, k_a = jax.random.split(key, 3)

    h = jax.random.normal(k_h, (N, D), dtype=jnp.float32)
    # Deterministic Linear weight (nn.Linear(hidden, hidden, bias=False): (D, D))
    bound = 1.0 / (D ** 0.5)
    w = jax.random.uniform(k_w, (D, D), minval=-bound, maxval=bound,
                           dtype=jnp.float32)
    # LayerNorm params at PyTorch defaults
    gamma = jnp.ones((D,), dtype=jnp.float32)
    beta = jnp.zeros((D,), dtype=jnp.float32)
    # Random sparse-ish binary adjacency (A[dst, src] = 1 if edge src->dst)
    adj = (jax.random.uniform(k_a, (N, N)) < 0.1).astype(jnp.float32)

    # tile_n=128 / tile_k=128 -> grid (2, 2): exercises K-tiled accumulation and
    # keeps the "parallel" axis multi-step (megacore sharding on v7x).
    out = graph_convolution(adj, h, w, gamma, beta, tile_n=128, tile_k=128)
    out = jax.block_until_ready(out)

    assert out.shape == (N, D)
    # Primary correctness gate: same-precision reference (tests kernel logic).
    ref_m = reference_matched(adj, h, w, gamma, beta)
    assert jnp.allclose(out, ref_m, atol=1e-3, rtol=1e-3), "mismatch vs matched ref"
    # Sanity check vs full-f32 reference (bf16 matmul operands -> looser tol).
    ref_f = reference_f32(adj, h, w, gamma, beta)
    assert jnp.allclose(out, ref_f, atol=7.5e-2, rtol=7.5e-2), "mismatch vs f32 ref"
    print("KERNEL_OK")
</pallas_src>

<mosaic_0001>
module attributes {stable_mosaic.version = 11 : i64} {
  func.func @gcn_kernel(%arg0: i32, %arg1: i32, %arg2: memref<128x128xbf16, #tpu.memory_space<vmem>>, %arg3: memref<128x128xbf16, #tpu.memory_space<vmem>>, %arg4: memref<128x128xf32, #tpu.memory_space<vmem>>, %arg5: memref<128x128xbf16, #tpu.memory_space<vmem>>, %arg6: memref<1x128xf32, #tpu.memory_space<vmem>>, %arg7: memref<1x128xf32, #tpu.memory_space<vmem>>, %arg8: memref<128x128xf32, #tpu.memory_space<vmem>>, %arg9: memref<128x128xf32, #tpu.memory_space<vmem>>) attributes {dimension_semantics = [#tpu.dimension_semantics<parallel>, #tpu.dimension_semantics<arbitrary>], iteration_bounds = array<i64: 2, 2>, scalar_prefetch = 0 : i64, scratch_operands = 1 : i64, tpu.core_type = #tpu.core_type<tc>, window_params = [{transform_indices = @transform_0, window_bounds = array<i64: 128, 128>}, {transform_indices = @transform_1, window_bounds = array<i64: 128, 128>}, {transform_indices = @transform_2, window_bounds = array<i64: 128, 128>}, {pipeline_mode = #tpu.pipeline_mode<synchronous>, transform_indices = @transform_3, window_bounds = array<i64: 128, 128>}, {pipeline_mode = #tpu.pipeline_mode<synchronous>, transform_indices = @transform_4, window_bounds = array<i64: 1, 128>}, {pipeline_mode = #tpu.pipeline_mode<synchronous>, transform_indices = @transform_5, window_bounds = array<i64: 1, 128>}, {transform_indices = @transform_6, window_bounds = array<i64: 128, 128>}]} {
    %c0_i32 = arith.constant 0 : i32
    %0 = arith.cmpi eq, %arg1, %c0_i32 : i32
    %1 = arith.extui %0 : i1 to i32
    %c0_i32_0 = arith.constant 0 : i32
    %2 = arith.cmpi ne, %1, %c0_i32_0 : i32
    scf.if %2 {
      %cst_9 = arith.constant 0.000000e+00 : f32
      %12 = vector.broadcast %cst_9 : f32 to vector<128x128xf32>
      %c0_10 = arith.constant 0 : index
      %c0_11 = arith.constant 0 : index
      %13 = vector.load %arg9[%c0_10, %c0_11] : memref<128x128xf32, #tpu.memory_space<vmem>>, vector<128x128xf32>
      tpu.vector_store %arg9[%c0_10, %c0_11], %12 {strides = array<i32>} : memref<128x128xf32, #tpu.memory_space<vmem>>, vector<128x128xf32>,
    } else {
    }
    %c0 = arith.constant 0 : index
    %c0_1 = arith.constant 0 : index
    %3 = vector.load %arg9[%c0, %c0_1] : memref<128x128xf32, #tpu.memory_space<vmem>>, vector<128x128xf32>
    %c0_2 = arith.constant 0 : index
    %c0_3 = arith.constant 0 : index
    %4 = vector.load %arg2[%c0_2, %c0_3] : memref<128x128xbf16, #tpu.memory_space<vmem>>, vector<128x128xbf16>
    %c0_4 = arith.constant 0 : index
    %c0_5 = arith.constant 0 : index
    %5 = vector.load %arg3[%c0_4, %c0_5] : memref<128x128xbf16, #tpu.memory_space<vmem>>, vector<128x128xbf16>
    %cst = arith.constant dense<0.000000e+00> : vector<128x128xf32>
    %6 = tpu.matmul %4, %5, %cst {dimension_numbers = #tpu.dot_dimension_numbers<[1], [0], [0], [1], [0, 0, 1, 1], [], []>} : vector<128x128xbf16>, vector<128x128xbf16>, vector<128x128xf32> -> vector<128x128xf32>
    %7 = arith.addf %3, %6 : vector<128x128xf32>
    %c0_6 = arith.constant 0 : index
    %c0_7 = arith.constant 0 : index
    %8 = vector.load %arg9[%c0_6, %c0_7] : memref<128x128xf32, #tpu.memory_space<vmem>>, vector<128x128xf32>
    tpu.vector_store %arg9[%c0_6, %c0_7], %7 {strides = array<i32>} : memref<128x128xf32, #tpu.memory_space<vmem>>, vector<128x128xf32>,
    %c1_i32 = arith.constant 1 : i32
    %9 = arith.cmpi eq, %arg1, %c1_i32 : i32
    %10 = arith.extui %9 : i1 to i32
    %c0_i32_8 = arith.constant 0 : i32
    %11 = arith.cmpi ne, %10, %c0_i32_8 : i32
    scf.if %11 {
      %c0_9 = arith.constant 0 : index
      %c0_10 = arith.constant 0 : index
      %12 = vector.load %arg9[%c0_9, %c0_10] : memref<128x128xf32, #tpu.memory_space<vmem>>, vector<128x128xf32>
      %13 = arith.truncf %12 : vector<128x128xf32> to vector<128x128xbf16>
      %c0_11 = arith.constant 0 : index
      %c0_12 = arith.constant 0 : index
      %14 = vector.load %arg5[%c0_11, %c0_12] : memref<128x128xbf16, #tpu.memory_space<vmem>>, vector<128x128xbf16>
      %cst_13 = arith.constant dense<0.000000e+00> : vector<128x128xf32>
      %15 = tpu.matmul %13, %14, %cst_13 {dimension_numbers = #tpu.dot_dimension_numbers<[1], [0], [0], [1], [0, 0, 1, 1], [], []>} : vector<128x128xbf16>, vector<128x128xbf16>, vector<128x128xf32> -> vector<128x128xf32>
      %cst_14 = arith.constant 0.000000e+00 : f32
      %16 = vector.broadcast %cst_14 : f32 to vector<128x128xf32>
      %17 = arith.maximumf %15, %16 : vector<128x128xf32>
      %c0_15 = arith.constant 0 : index
      %c0_16 = arith.constant 0 : index
      %18 = vector.load %arg4[%c0_15, %c0_16] : memref<128x128xf32, #tpu.memory_space<vmem>>, vector<128x128xf32>
      %19 = arith.addf %17, %18 : vector<128x128xf32>
      %cst_17 = arith.constant dense<0.000000e+00> : vector<128xf32>
      %20 = vector.multi_reduction <add>, %19, %cst_17 [1] : vector<128x128xf32> to vector<128xf32>
      %21 = vector.shape_cast %20 : vector<128xf32> to vector<128x1xf32>
      %cst_18 = arith.constant 1.280000e+02 : f32
      %22 = vector.broadcast %cst_18 : f32 to vector<128x1xf32>
      %23 = arith.divf %21, %22 : vector<128x1xf32>
      %24 = vector.broadcast %23 : vector<128x1xf32> to vector<128x128xf32>
      %25 = arith.subf %19, %24 : vector<128x128xf32>
      %26 = arith.mulf %25, %25 : vector<128x128xf32>
      %cst_19 = arith.constant dense<0.000000e+00> : vector<128xf32>
      %27 = vector.multi_reduction <add>, %26, %cst_19 [1] : vector<128x128xf32> to vector<128xf32>
      %28 = vector.shape_cast %27 : vector<128xf32> to vector<128x1xf32>
      %cst_20 = arith.constant 1.280000e+02 : f32
      %29 = vector.broadcast %cst_20 : f32 to vector<128x1xf32>
      %30 = arith.divf %28, %29 : vector<128x1xf32>
      %cst_21 = arith.constant 9.99999974E-6 : f32
      %31 = vector.broadcast %cst_21 : f32 to vector<128x1xf32>
      %32 = arith.addf %30, %31 : vector<128x1xf32>
      %33 = math.rsqrt %32 : vector<128x1xf32>
      %c0_22 = arith.constant 0 : index
      %c0_23 = arith.constant 0 : index
      %34 = vector.load %arg6[%c0_22, %c0_23] : memref<1x128xf32, #tpu.memory_space<vmem>>, vector<1x128xf32>
      %35 = vector.broadcast %33 : vector<128x1xf32> to vector<128x128xf32>
      %36 = vector.broadcast %34 : vector<1x128xf32> to vector<128x128xf32>
      %37 = arith.mulf %35, %36 : vector<128x128xf32>
      %38 = arith.mulf %25, %37 : vector<128x128xf32>
      %c0_24 = arith.constant 0 : index
      %c0_25 = arith.constant 0 : index
      %39 = vector.load %arg7[%c0_24, %c0_25] : memref<1x128xf32, #tpu.memory_space<vmem>>, vector<1x128xf32>
      %40 = vector.broadcast %39 : vector<1x128xf32> to vector<128x128xf32>
      %41 = arith.addf %38, %40 : vector<128x128xf32>
      %c0_26 = arith.constant 0 : index
      %c0_27 = arith.constant 0 : index
      %42 = vector.load %arg8[%c0_26, %c0_27] : memref<128x128xf32, #tpu.memory_space<vmem>>, vector<128x128xf32>
      tpu.vector_store %arg8[%c0_26, %c0_27], %41 {strides = array<i32>} : memref<128x128xf32, #tpu.memory_space<vmem>>, vector<128x128xf32>,
    } else {
    }
    return
  }
  func.func @transform_0(%arg0: i32, %arg1: i32) -> (i32, i32) {
    %c0_i32 = arith.constant 0 : i32
    return %arg0, %arg1 : i32, i32
  }
  func.func @transform_1(%arg0: i32, %arg1: i32) -> (i32, i32) {
    %c0_i32 = arith.constant 0 : i32
    %c0_i32_0 = arith.constant 0 : i32
    return %arg1, %c0_i32 : i32, i32
  }
  func.func @transform_2(%arg0: i32, %arg1: i32) -> (i32, i32) {
    %c0_i32 = arith.constant 0 : i32
    %c0_i32_0 = arith.constant 0 : i32
    return %arg0, %c0_i32 : i32, i32
  }
  func.func @transform_3(%arg0: i32, %arg1: i32) -> (i32, i32) {
    %c0_i32 = arith.constant 0 : i32
    %c0_i32_0 = arith.constant 0 : i32
    %c0_i32_1 = arith.constant 0 : i32
    return %c0_i32, %c0_i32_0 : i32, i32
  }
  func.func @transform_4(%arg0: i32, %arg1: i32) -> (i32, i32) {
    %c0_i32 = arith.constant 0 : i32
    %c0_i32_0 = arith.constant 0 : i32
    %c0_i32_1 = arith.constant 0 : i32
    return %c0_i32, %c0_i32_0 : i32, i32
  }
  func.func @transform_5(%arg0: i32, %arg1: i32) -> (i32, i32) {
    %c0_i32 = arith.constant 0 : i32
    %c0_i32_0 = arith.constant 0 : i32
    %c0_i32_1 = arith.constant 0 : i32
    return %c0_i32, %c0_i32_0 : i32, i32
  }
  func.func @transform_6(%arg0: i32, %arg1: i32) -> (i32, i32) {
    %c0_i32 = arith.constant 0 : i32
    %c0_i32_0 = arith.constant 0 : i32
    return %arg0, %c0_i32 : i32, i32
  }
}

</mosaic_0001>

<bundles_post_ra>
// kernel: tpu_custom_call.1
= control target key start
LH: loop header
LB: loop body
LE: loop exit
PB: predicated region body
PF: predicated region fallthrough
CT: control target
= control target key end

     0   :  { %s2757_s0 = inlined_call_operand.hbm [shape: bf16[256,256], index: 0, kind: input, shape index: {}]   ;;  %s2758_s1 = inlined_call_operand.hbm [shape: bf16[256,128], index: 1, kind: input, shape index: {}]   ;;  %s2759_s2 = inlined_call_operand.hbm [shape: f32[256,128], index: 2, kind: input, shape index: {}]   ;;  %s2760_s3 = inlined_call_operand.hbm [shape: bf16[128,128], index: 3, kind: input, shape index: {}]   ;;  %s2761_s4 = inlined_call_operand.vmem [shape: f32[1,128], index: 4, kind: input, shape index: {}]   ;;  %s2762_s5 = inlined_call_operand.vmem [shape: f32[1,128], index: 5, kind: input, shape index: {}]   ;;  %s2763_s6 = inlined_call_operand.hbm [shape: f32[256,128], index: 6, kind: output, shape index: {}]  }
   0x1   :  { %2773 = sst [smem:[#allocation26_spill]] %s2757_s0 }
   0x2   :  { %2774 = sst [smem:[#allocation27_spill]] %s2758_s1 }
   0x3   :  { %2775 = sst [smem:[#allocation28_spill]] %s2760_s3 }
   0x4   :  { %2776 = sst [smem:[#allocation29_spill]] %s2761_s4 }
   0x5   :  { %2777 = sst [smem:[#allocation30_spill]] %s2762_s5 }
   0x6   :  { %2778 = sst [smem:[#allocation31_spill]] %s2763_s6 }
   0x7   :  { %11 = vsyncpa [#allocation4], 0 }
   0x8   :  { %13 = vsyncpa [#allocation4 + $0x1], 0 }
   0x9   :  { %14 = vsyncpa [#allocation7], 0 }
   0xa   :  { %16 = vsyncpa [#allocation7 + $0x1], 0 }
   0xb   :  { %17 = vsyncpa [#allocation10], 0 }
   0xc   :  { %18 = vsyncpa [#allocation5], 0 }
   0xd   :  { %20 = vsyncpa [#allocation5 + $0x1], 0  ;;  %s2077_s21 = smov 0   ;;  %s2079_s22 = smov 0  }
   0xe   :  { %s2081_s23 = smov 0   ;;  %s2083_s24 = smov 0  }
   0xf   :  { %s2085_s25 = smov 0   ;;  %s2087_s26 = smov 0  }
  0x10   :  { %s2089_s27 = smov 0   ;;  %s2091_s28 = smov 0  }
  0x11   :  { %s2093_s29 = smov 0   ;;  %s2095_s30 = smov 0  }
  0x12   :  { %s2097_s7 = smov 0   ;;  %s2099_s8 = smov 0  }
  0x13   :  { %s2101_s9 = smov 0   ;;  %s2103_s10 = smov 0  }
  0x14 LB: > { %2779 = sst [smem:[#allocation17_spill]] %s1999_s26  ;;  %s35_s11 = sadd.s32 1, %s2023_s8  ;;  %s2031_s10 = sphi %s2103_s10, %s26_s10   ;;  %s2027_s9 = sphi %s2101_s9, %s2814_s9   ;;  %s2023_s8 = sphi %s2099_s8, %s2813_s8   ;;  %s2019_s7 = sphi %s2097_s7, %s2812_s7   ;;  %s2015_s30 = sphi %s2095_s30, %s2811_s30   ;;  %s2011_s29 = sphi %s2093_s29, %s2810_s29   ;;  %s2007_s28 = sphi %s2091_s28, %s2821_s28   ;;  %s2003_s27 = sphi %s2089_s27, %s2820_s27   ;;  %s1999_s26 = sphi %s2087_s26, %s2808_s26   ;;  %s1995_s25 = sphi %s2085_s25, %s2819_s25   ;;  %s1991_s24 = sphi %s2083_s24, %s2818_s24   ;;  %s1987_s23 = sphi %s2081_s23, %s2817_s23   ;;  %s1983_s22 = sphi %s2079_s22, %s2816_s22   ;;  %s1979_s21 = sphi %s2077_s21, %s2815_s21  }
  0x15   : > { %2780 = sst [smem:[#allocation18_spill]] %s2011_s29  ;;  %s38_s12 = sadd.s32 1, %s2027_s9 }
  0x16   : > { %2781 = sst [smem:[#allocation19_spill]] %s2019_s7  ;;  %p36_p0 = scmp.ge.s32.totalorder %s35_s11, 2 }
  0x17   : > { %2782 = sst [smem:[#allocation20_spill]] %s2023_s8  ;;  %p55_p1 = scmp.eq.s32.totalorder %s2031_s10, 0 }
  0x18   : > { %2783 = sst [smem:[#allocation21_spill]] %s2027_s9  ;;  %s73_s13 = sadd.s32 1, %s1999_s26 }
  0x19   : > { %p80_p2 = scmp.ne.s32.totalorder %s1999_s26, %s1995_s25  ;;  %s2823_s11 = smov (%p36_p0, %s35_s11), 0 }
  0x1a   : > { %2784 = sst [smem:[#allocation22_spill]] %s2823_s11  ;;  %s2825_s12 = smov (!%p36_p0, %s38_s12), %s2027_s9 }
  0x1b   : > { %s43_s14 = ssub.s32 %s2023_s8, %s2823_s11  ;;  %p2160_p3 = por %p80_p2, %p55_p1 }
  0x1c   : > { %p40_p4 = scmp.ge.s32.totalorder %s2825_s12, 2  ;;  %p71_p5 = scmp.eq.s32.totalorder %s43_s14, 0 }
  0x1d   : > { %p86_p6 = scmp.ne.s32.totalorder %s1995_s25, %s1991_s24  ;;  %p1593_p9 = scmp.lt.s32.totalorder %s2031_s10, 4 }
  0x1e   : > { %s2827_s12 = smov (%p40_p4, %s2825_s12), 0  ;;  %s269_s20 = sand.u32 1, %s2031_s10  }
  0x1f   : > { %2786 = sst [smem:[#allocation23_spill]] %s2827_s12  ;;  %s2173_s17 = ssub.s32 %s2027_s9, %s2827_s12 }
  0x20   : > { %s2169_s16 = scalar_select %p71_p5, %s1999_s26, %s73_s13  }
  0x21   : > { %s44_s18 = sor.u32 %s43_s14, %s2173_s17  ;;  %p97_p7 = scmp.eq.s32.totalorder %s2173_s17, 0 }
  0x22   : > { %2787 = sst [smem:[#allocation24_spill]] %s2169_s16  ;;  %p2177_p8 = scmp.eq.s32.totalorder %s44_s18, 0 }
  0x23   : > { %s271_s11 = sand.u32 1, %s1999_s26   ;;  %s1487_s13 = sshll.u32 %s2023_s8, 6 }
  0x24   : > { %s1371_s6 = sshll.u32 %s271_s11, 6  ;;  %s2789_s1 = sld [smem:[#allocation27_spill]] }
  0x25   : > { %s273_s5 = scalar_lea.vmem [#allocation6], %s1371_s6  ;;  %p1582_p10 = pnand %p1593_p9, %p2160_p3 }
  0x26   : > { %s281_s18 = sshll.u32 %s273_s5, 4  ;;  %s2192_s4 = scalar_lea.sflag [#allocation7], %s269_s20  ;;  %s282_s18 = int_to_ptr.vmem [resolvable:$true] %s281_s18 }
  0x27   : > { %s2768_s11 = smov 64   ;;  %s2769_s26 = smov 4  }
  0x28   : > { %s2199_s7 = sadd.s32 4294967295, %s2031_s10   ;;  %p1364_p11 = scmp.ge.s32.totalorder %s2031_s10, 1 }
  0x29   : > { %p61_p12 = scmp.eq.s32.totalorder %s2199_s7, 0  ;;  %p199_p13 = scmp.eq.s32.totalorder %s2199_s7, 3 }
  0x2a   : > { %s278_s12 = scalar_lea.hbm %s2789_s1, %s1487_s13  ;;  %p212_p0 = scmp.lt.s32.totalorder %s2031_s10, 5 }
  0x2b   : > { %s279_s14 = sshll.u32 %s278_s12, 4  ;;  %p2210_p2 = por %p86_p6, %p61_p12  ;;  %s280_s14 = int_to_ptr.hbm [resolvable:$true] %s279_s14 }
  0x2c   : > { %1584 = dma.hbm_to_vmem [thread:$0]  (!%p1582_p10), %s280_s14, 1024, %s282_s18, %s2192_s4, %s2768_s11, %s2768_s11, %s2769_s26  }
  0x2d   : > { %s2791_s3 = sld [smem:[#allocation28_spill]]  ;;  %p2217_p3 = pnand %p1364_p11, %p212_p0 }
  0x2e   : > { %s2035_s24 = smov [#allocation9]   ;;  %s47_s13 = sadd.s32 1, %s2011_s29 }
  0x2f   : > { %p1574_p4 = pneg %p2217_p3  ;;  %s225_s20 = sshll.u32 %s2035_s24, 4  ;;  %s226_s20 = int_to_ptr.vmem [resolvable:$true] %s225_s20 }
  0x30   : > { %p54_p6 = scmp.ne.s32.totalorder %s2011_s29, %s2007_s28  ;;  %p60_p11 = scmp.ne.s32.totalorder %s2007_s28, %s2003_s27 }
  0x31   : > { %p1575_p5 = pnand %p1574_p4, %p61_p12  ;;  %s245_s6 = sand.u32 1, %s2011_s29  }
  0x32   : > { %s2234_s14 = scalar_select %p2177_p8, %s2011_s29, %s47_s13  }
  0x33   : > { %s223_s15 = sshll.u32 %s2791_s3, 4  ;;  %p2238_p10 = por %p55_p1, %p54_p6  ;;  %s224_s15 = int_to_ptr.hbm [resolvable:$true] %s223_s15 }
  0x34   : > { %1577 = dma.hbm_to_vmem [thread:$0]  (!%p1575_p5), %s224_s15, 1024, %s226_s20, [#allocation10], %s2768_s11, %s2768_s11, %s2769_s26  }
  0x35   : > { %2793 = sst [smem:[#allocation25_spill]] %s2234_s14  ;;  %s1486_s12 = sshll.u32 %s2027_s9, 5 }
  0x36   : > { %p2248_p0 = por %p61_p12, %p60_p11  ;;  %s1367_s19 = sshll.u32 %s245_s6, 6 }
  0x37   : > { %s254_s24 = sadd.s32 %s2023_s8, %s1486_s12  ;;  %s2796_s0 = sld [smem:[#allocation26_spill]] }
  0x38   : > { %s1370_s20 = sshll.u32 %s254_s24, 2  ;;  %s249_s26 = scalar_lea.vmem [#allocation3], %s1367_s19 }
  0x39   : > { %s259_s1 = sshll.u32 %s249_s26, 4  ;;  %p1579_p8 = pnand %p1593_p9, %p2238_p10  ;;  %s260_s1 = int_to_ptr.vmem [resolvable:$true] %s259_s1 }
  0x3a   : > { %s246_s12 = scalar_lea.sflag [#allocation4], %s245_s6  ;;  %s2036_s8 = smov 128  }
  0x3b   : > { %s2797_s24 = smov 4   ;;  %s2798_s14 = smov 64  }
  0x3c   : > { %s1363_s13 = sadd.s32 4294967294, %s2031_s10   ;;  %p106_p4 = scmp.ne.s32.totalorder %s1987_s23, %s1983_s22 }
  0x3d   : > { %s256_s11 = scalar_lea.hbm %s2796_s0, %s1370_s20  ;;  %s99_s20 = sadd.s32 1, %s1987_s23 }
  0x3e   : > { %s257_s3 = sshll.u32 %s256_s11, 4  ;;  %p112_p5 = scmp.ne.s32.totalorder %s1983_s22, %s1979_s21  ;;  %s258_s3 = int_to_ptr.hbm [resolvable:$true] %s257_s3 }
  0x3f   : > { %1581 = dma.hbm_to_vmem [thread:$0]  (!%p1579_p8), %s258_s3, 1024, %s260_s1, %s246_s12, %s2036_s8, %s2798_s14, %s2797_s24  }
  0x40   : > { %s2267_s19 = scalar_select %p97_p7, %s1987_s23, %s99_s20  }
  0x41   : > { %p205_p6 = scmp.eq.s32.totalorder %s1363_s13, 3  ;;  %s293_s26 = sand.u32 1, %s1987_s23  }
  0x42   : > { %p108_p11 = por %p106_p4, %p55_p1  ;;  %p2278_p10 = por %p112_p5, %p61_p12 }
  0x43   : > { %p2284_p8 = por %p199_p13, %p106_p4  ;;  %p2288_p7 = por %p205_p6, %p112_p5 }
  0x44   : > { %s1374_s17 = sshll.u32 %s293_s26, 7  ;;  %s1488_s14 = sshll.u32 %s2027_s9, 7 }
  0x45   : > { %s300_s27 = scalar_lea.hbm %s2759_s2, %s1488_s14  ;;  %s295_s24 = scalar_lea.vmem [#allocation8], %s1374_s17 }
  0x46   : > { %s301_s12 = sshll.u32 %s300_s27, 4  ;;  %s303_s13 = sshll.u32 %s295_s24, 4  ;;  %s302_s12 = int_to_ptr.hbm [resolvable:$true] %s301_s12  ;;  %s304_s13 = int_to_ptr.vmem [resolvable:$true] %s303_s13 }
  0x47   : > { %p1585_p1 = pnand %p1593_p9, %p108_p11  ;;  %s2037_s20 = smov 8  }
  0x48   : > { %315 = sbr.rel (%p2217_p3) target bundleno = 811 (0x32b), region = 44  ;;  %s317_s26 = sand.u32 (!%p2217_p3), 1, %s2007_s28  }
  0x49   : > { %1587 = dma.hbm_to_vmem [thread:$0]  (!%p1585_p1), %s302_s12, 2048, %s304_s13, %s2192_s4, %s2036_s8, %s2036_s8, %s2037_s20  }
  0x4a   : > { %s1378_s0 = sshll.u32 (!%p2217_p3), %s317_s26, 6  ;;  %s318_s9 = scalar_lea.sflag (!%p2217_p3), [#allocation4], %s317_s26 }
  0x4b   : > { %s2302_s29 = scalar_lea.vmem (!%p2217_p3), [#allocation3], %s1378_s0 }
  0x4d   : > { %1958 = dma.done.wait (%p2248_p0), %s318_s9, 1024  }
  0x4e   : > { %1960 = vsyncadd (%p2248_p0), %s318_s9, 4294966272  ;;  %s327_s17 = sand.u32 1, %s2199_s7   ;;  %s329_s4 = sand.u32 1, %s1995_s25  }
  0x4f   : > { %s1379_s8 = sshll.u32 %s329_s4, 6  ;;  %s328_s16 = scalar_lea.sflag [#allocation7], %s327_s17 }
  0x50   : > { %s2310_s14 = scalar_lea.vmem [#allocation6], %s1379_s8 }
  0x51   : > { %1962 = dma.done.wait (%p2210_p2), %s328_s16, 1024  }
  0x52   : > { %1964 = vsyncadd (%p2210_p2), %s328_s16, 4294966272  ;;  %s339_s0 = sand.u32 1, %s1983_s22  }
  0x53   : > { %s1380_s9 = sshll.u32 %s339_s0, 7 }
  0x54   : > { %s2319_s15 = scalar_lea.vmem [#allocation8], %s1380_s9 }
  0x55   : > { %1966 = dma.done.wait (%p2278_p10), %s328_s16, 2048  }
  0x56   : > { %1968 = vsyncadd (%p2278_p10), %s328_s16, 4294965248 }
  0x57   : > { %1970 = dma.done.wait (%p61_p12), [#allocation10], 1024  }
  0x58   : > { %1972 = vsyncadd (%p61_p12), [#allocation10], 4294966272  ;;  %s2329_s5 = scalar_lea.vmem [#allocation11], %s1380_s9  ;;  %p1383_p9 = scmp.ne.s32.totalorder %s2015_s30, 0 }
  0x5a   : > { %393 = sbr.rel (%p1383_p9) target bundleno = 112 (0x70), region = 64 }
  0x5f   : > { %v2038_v0 = vmov 0.0  }
  0x60   : > { %394 = vst [vmem:[#allocation2 + $0x30] sm:$0xff] %v2038_v0 }
  0x61   : > { %395 = vst [vmem:[#allocation2] sm:$0xff] %v2038_v0 }
  0x62   : > { %396 = vst [vmem:[#allocation2 + $0x58] sm:$0xff] %v2038_v0 }
  0x63   : > { %397 = vst [vmem:[#allocation2 + $0x18] sm:$0xff] %v2038_v0 }
  0x64   : > { %398 = vst [vmem:[#allocation2 + $0x50] sm:$0xff] %v2038_v0 }
  0x65   : > { %399 = vst [vmem:[#allocation2 + $0x68] sm:$0xff] %v2038_v0 }
  0x66   : > { %400 = vst [vmem:[#allocation2 + $0x8] sm:$0xff] %v2038_v0 }
  0x67   : > { %401 = vst [vmem:[#allocation2 + $0x48] sm:$0xff] %v2038_v0 }
  0x68   : > { %402 = vst [vmem:[#allocation2 + $0x40] sm:$0xff] %v2038_v0 }
  0x69   : > { %403 = vst [vmem:[#allocation2 + $0x20] sm:$0xff] %v2038_v0 }
  0x6a   : > { %404 = vst [vmem:[#allocation2 + $0x10] sm:$0xff] %v2038_v0 }
  0x6b   : > { %405 = vst [vmem:[#allocation2 + $0x38] sm:$0xff] %v2038_v0 }
  0x6c   : > { %406 = vst [vmem:[#allocation2 + $0x60] sm:$0xff] %v2038_v0 }
  0x6d   : > { %407 = vst [vmem:[#allocation2 + $0x70] sm:$0xff] %v2038_v0 }
  0x6e   : > { %408 = vst [vmem:[#allocation2 + $0x78] sm:$0xff] %v2038_v0 }
  0x6f   : > { %409 = vst [vmem:[#allocation2 + $0x28] sm:$0xff] %v2038_v0 }
  0x70 PF: > { %v1504_v1 = vld [vmem:[%s2310_s14 + $0x38] sm:$0xff]  ;;  %v1503_v2 = vld [vmem:[%s2310_s14 + $0x30] sm:$0xff]  ;;  %v1502_v3 = vld [vmem:[%s2310_s14 + $0x28] sm:$0xff]  ;;  %p1448_p12 = scmp.ne.s32.totalorder %s2015_s30, 1 }
  0x71   : > { %554 = vmatpush.bf16.msra.mxu0 %v1504_v1  ;;  %1514 = vmatpush.bf16.msra.mxu1 %v1504_v1  ;;  %v1501_v4 = vld [vmem:[%s2310_s14 + $0x20] sm:$0xff]  ;;  %v1500_v5 = vld [vmem:[%s2310_s14 + $0x18] sm:$0xff]  ;;  %v1499_v6 = vld [vmem:[%s2310_s14 + $0x10] sm:$0xff]  ;;  %s2802_s7 = sld [smem:[#allocation29_spill]] (!%p1448_p12) }
  0x72   : > { %1515 = vmatpush.bf16.msra.mxu2 %v1504_v1  ;;  %1516 = vmatpush.bf16.msra.mxu3 %v1504_v1  ;;  %v1498_v7 = vld [vmem:[%s2310_s14 + $0x8] sm:$0xff]  ;;  %v1497_v8 = vld [vmem:[%s2310_s14] sm:$0xff]  ;;  %v1491_v10 = vld [vmem:[%s2302_s29 + $0x10] sm:$0xff]  ;;  %s2803_s6 = sld [smem:[#allocation30_spill]] (!%p1448_p12) }
  0x73   : > { %v1489_v9 = vld [vmem:[%s2302_s29] sm:$0xff]  ;;  %v1495_v12 = vld [vmem:[%s2302_s29 + $0x30] sm:$0xff]  ;;  %v1490_v13 = vld [vmem:[%s2302_s29 + $0x8] sm:$0xff] }
  0x74   : > { %v1493_v11 = vld [vmem:[%s2302_s29 + $0x20] sm:$0xff]  ;;  %v1492_v14 = vld [vmem:[%s2302_s29 + $0x18] sm:$0xff]  ;;  %v1494_v15 = vld [vmem:[%s2302_s29 + $0x28] sm:$0xff] }
  0x75   : > { %555 = vmatpush.bf16.msra.mxu0 %v1503_v2  ;;  %1517 = vmatpush.bf16.msra.mxu1 %v1503_v2  ;;  %v1496_v16 = vld [vmem:[%s2302_s29 + $0x38] sm:$0xff]  ;;  %v410_v17 = vld [vmem:[#allocation2 + $0x30] sm:$0xff]  ;;  %v418_v23 = vld [vmem:[#allocation2 + $0x40] sm:$0xff] }
  0x76   : > { %1518 = vmatpush.bf16.msra.mxu2 %v1503_v2  ;;  %1519 = vmatpush.bf16.msra.mxu3 %v1503_v2  ;;  %v414_v18 = vld [vmem:[#allocation2 + $0x50] sm:$0xff]  ;;  %v422_v24 = vld [vmem:[#allocation2 + $0x60] sm:$0xff]  ;;  %v415_v26 = vld [vmem:[#allocation2 + $0x68] sm:$0xff] }
  0x77   : > { %v411_v25 = vld [vmem:[#allocation2] sm:$0xff]  ;;  %v423_v36 = vld [vmem:[#allocation2 + $0x70] sm:$0xff]  ;;  %v412_v37 = vld [vmem:[#allocation2 + $0x58] sm:$0xff] }
  0x78   : > { %v419_v35 = vld [vmem:[#allocation2 + $0x20] sm:$0xff]  ;;  %v416_v38 = vld [vmem:[#allocation2 + $0x8] sm:$0xff]  ;;  %v420_v47 = vld [vmem:[#allocation2 + $0x10] sm:$0xff] }
  0x79   : > { %556 = vmatpush.bf16.msra.mxu0 %v1502_v3  ;;  %1520 = vmatpush.bf16.msra.mxu1 %v1502_v3  ;;  %v424_v48 = vld [vmem:[#allocation2 + $0x78] sm:$0xff]  ;;  %v417_v50 = vld [vmem:[#allocation2 + $0x48] sm:$0xff] }
  0x7a   : > { %1521 = vmatpush.bf16.msra.mxu2 %v1502_v3  ;;  %1522 = vmatpush.bf16.msra.mxu3 %v1502_v3  ;;  %v413_v49 = vld [vmem:[#allocation2 + $0x18] sm:$0xff]  ;;  %v425_v60 = vld [vmem:[#allocation2 + $0x28] sm:$0xff] }
  0x7b   : > { %v421_v59 = vld [vmem:[#allocation2 + $0x38] sm:$0xff] }
  0x7d   : > { %557 = vmatpush.bf16.msra.mxu0 %v1501_v4  ;;  %1523 = vmatpush.bf16.msra.mxu1 %v1501_v4 }
  0x7e   : > { %1524 = vmatpush.bf16.msra.mxu2 %v1501_v4  ;;  %1525 = vmatpush.bf16.msra.mxu3 %v1501_v4 }
  0x81   : > { %558 = vmatpush.bf16.msra.mxu0 %v1500_v5  ;;  %1526 = vmatpush.bf16.msra.mxu1 %v1500_v5 }
  0x82   : > { %1527 = vmatpush.bf16.msra.mxu2 %v1500_v5  ;;  %1528 = vmatpush.bf16.msra.mxu3 %v1500_v5 }
  0x85   : > { %559 = vmatpush.bf16.msra.mxu0 %v1499_v6  ;;  %1529 = vmatpush.bf16.msra.mxu1 %v1499_v6 }
  0x86   : > { %1530 = vmatpush.bf16.msra.mxu2 %v1499_v6  ;;  %1531 = vmatpush.bf16.msra.mxu3 %v1499_v6 }
  0x89   : > { %560 = vmatpush.bf16.msra.mxu0 %v1498_v7  ;;  %1532 = vmatpush.bf16.msra.mxu1 %v1498_v7 }
  0x8a   : > { %1533 = vmatpush.bf16.msra.mxu2 %v1498_v7  ;;  %1534 = vmatpush.bf16.msra.mxu3 %v1498_v7 }
  0x8d   : > { %561 = vmatpush.bf16.msra.mxu0 %v1497_v8  ;;  %1535 = vmatpush.bf16.msra.mxu1 %v1497_v8 }
  0x8e   : > { %1536 = vmatpush.bf16.msra.mxu2 %v1497_v8  ;;  %1537 = vmatpush.bf16.msra.mxu3 %v1497_v8 }
  0x90   : > { %562 = vmatmul.bf16.vlgmr.msra.gmra.mxu0 %v1489_v9  ;;  %572 = vmatmul.bf16.vlgmr.msra.gmra.mxu1 %v1491_v10 }
  0x91   : > { %582 = vmatmul.bf16.vlgmr.msra.gmra.mxu2 %v1493_v11  ;;  %592 = vmatmul.bf16.vlgmr.msra.gmra.mxu3 %v1495_v12 }
  0xa0   : > { %567 = vmatmul.bf16.gmra.mxu0 %v1490_v13  ;;  %577 = vmatmul.bf16.gmra.mxu1 %v1492_v14 }
  0xa1   : > { %587 = vmatmul.bf16.gmra.mxu2 %v1494_v15  ;;  %597 = vmatmul.bf16.gmra.mxu3 %v1496_v16 }
 0x10d   : > { %v563_v19 = vpop.f32.mrf.mxu0  ;;  %v573_v20 = vpop.f32.mrf.mxu1 }
 0x10e   : > { %v603_v21 = vadd.f32 %v563_v19, %v410_v17  ;;  %v607_v22 = vadd.f32 %v573_v20, %v414_v18 }
 0x110   : > { %619 = vst [vmem:[#allocation2 + $0x30] sm:$0xff] %v603_v21 }
 0x111   : > { %623 = vst [vmem:[#allocation2 + $0x50] sm:$0xff] %v607_v22 }
 0x114   : > { %v583_v27 = vpop.f32.mrf.mxu2  ;;  %v593_v28 = vpop.f32.mrf.mxu3 }
 0x115   : > { %v611_v29 = vadd.f32 %v583_v27, %v418_v23  ;;  %v615_v30 = vadd.f32 %v593_v28, %v422_v24  ;;  %v565_v31 = vpop.f32.mrf.mxu0  ;;  %v575_v32 = vpop.f32.mrf.mxu1 }
 0x116   : > { %v604_v33 = vadd.f32 %v565_v31, %v411_v25  ;;  %v608_v34 = vadd.f32 %v575_v32, %v415_v26 }
 0x117   : > { %627 = vst [vmem:[#allocation2 + $0x40] sm:$0xff] %v611_v29 }
 0x118   : > { %631 = vst [vmem:[#allocation2 + $0x60] sm:$0xff] %v615_v30 }
 0x119   : > { %620 = vst [vmem:[#allocation2] sm:$0xff] %v604_v33 }
 0x11a   : > { %624 = vst [vmem:[#allocation2 + $0x68] sm:$0xff] %v608_v34 }
 0x11c   : > { %v585_v39 = vpop.f32.mrf.mxu2  ;;  %v595_v40 = vpop.f32.mrf.mxu3 }
 0x11d   : > { %v612_v41 = vadd.f32 %v585_v39, %v419_v35  ;;  %v616_v42 = vadd.f32 %v595_v40, %v423_v36  ;;  %v568_v43 = vpop.f32.mrf.mxu0  ;;  %v578_v44 = vpop.f32.mrf.mxu1 }
 0x11e   : > { %v605_v45 = vadd.f32 %v568_v43, %v412_v37  ;;  %v609_v46 = vadd.f32 %v578_v44, %v416_v38 }
 0x11f   : > { %628 = vst [vmem:[#allocation2 + $0x20] sm:$0xff] %v612_v41 }
 0x120   : > { %632 = vst [vmem:[#allocation2 + $0x70] sm:$0xff] %v616_v42 }
 0x121   : > { %621 = vst [vmem:[#allocation2 + $0x58] sm:$0xff] %v605_v45 }
 0x122   : > { %625 = vst [vmem:[#allocation2 + $0x8] sm:$0xff] %v609_v46 }
 0x124   : > { %v588_v51 = vpop.f32.mrf.mxu2  ;;  %v598_v52 = vpop.f32.mrf.mxu3 }
 0x125   : > { %v613_v53 = vadd.f32 %v588_v51, %v420_v47  ;;  %v617_v54 = vadd.f32 %v598_v52, %v424_v48  ;;  %v570_v55 = vpop.f32.mrf.mxu0  ;;  %v580_v56 = vpop.f32.mrf.mxu1 }
 0x126   : > { %v606_v57 = vadd.f32 %v570_v55, %v413_v49  ;;  %v610_v58 = vadd.f32 %v580_v56, %v417_v50 }
 0x127   : > { %629 = vst [vmem:[#allocation2 + $0x10] sm:$0xff] %v613_v53 }
 0x128   : > { %633 = vst [vmem:[#allocation2 + $0x78] sm:$0xff] %v617_v54 }
 0x129   : > { %622 = vst [vmem:[#allocation2 + $0x18] sm:$0xff] %v606_v57 }
 0x12a   : > { %626 = vst [vmem:[#allocation2 + $0x48] sm:$0xff] %v610_v58 }
 0x12c   : > { %v590_v61 = vpop.f32.mrf.mxu2  ;;  %v600_v62 = vpop.f32.mrf.mxu3  ;;  %638 = sbr.rel (%p1448_p12) target bundleno = 789 (0x315), region = 68 }
 0x12d   : > { %v614_v63 = vadd.f32 %v590_v61, %v421_v59  ;;  %v618_v0 = vadd.f32 %v600_v62, %v425_v60 }
 0x12f   : > { %630 = vst [vmem:[#allocation2 + $0x38] sm:$0xff] %v614_v63 }
 0x130   : > { %634 = vst [vmem:[#allocation2 + $0x28] sm:$0xff] %v618_v0 }
 0x131   : > { %v1512_v1 = vld [vmem:[#allocation9 + $0x38] sm:$0xff]  ;;  %v1511_v2 = vld [vmem:[#allocation9 + $0x30] sm:$0xff]  ;;  %v1510_v3 = vld [vmem:[#allocation9 + $0x28] sm:$0xff] }
 0x132   : > { %727 = vmatpush.bf16.msra.mxu0 %v1512_v1  ;;  %1538 = vmatpush.bf16.msra.mxu1 %v1512_v1  ;;  %v1509_v4 = vld [vmem:[#allocation9 + $0x20] sm:$0xff]  ;;  %v1508_v5 = vld [vmem:[#allocation9 + $0x18] sm:$0xff]  ;;  %v1507_v6 = vld [vmem:[#allocation9 + $0x10] sm:$0xff] }
 0x133   : > { %1539 = vmatpush.bf16.msra.mxu2 %v1512_v1  ;;  %1540 = vmatpush.bf16.msra.mxu3 %v1512_v1  ;;  %v1506_v7 = vld [vmem:[#allocation9 + $0x8] sm:$0xff]  ;;  %v1505_v8 = vld [vmem:[#allocation9] sm:$0xff]  ;;  %v639_v9 = vld [vmem:[#allocation2 + $0x30] sm:$0xff] }
 0x134   : > { %v640_v10 = vld [vmem:[#allocation2] sm:$0xff]  ;;  %v643_v11 = vld [vmem:[#allocation2 + $0x50] sm:$0xff]  ;;  %v644_v12 = vld [vmem:[#allocation2 + $0x68] sm:$0xff] }
 0x135   : > { %v647_v13 = vld [vmem:[#allocation2 + $0x40] sm:$0xff]  ;;  %v652_v16 = vld [vmem:[#allocation2 + $0x70] sm:$0xff]  ;;  %v655_v17 = vpack.c.bf16 %v640_v10, %v639_v9  ;;  %v657_v18 = vpack.c.bf16 %v644_v12, %v643_v11  ;;  %v641_v21 = vld [vmem:[#allocation2 + $0x58] sm:$0xff] }
 0x136   : > { %728 = vmatpush.bf16.msra.mxu0 %v1511_v2  ;;  %1541 = vmatpush.bf16.msra.mxu1 %v1511_v2  ;;  %v648_v14 = vld [vmem:[#allocation2 + $0x20] sm:$0xff]  ;;  %v642_v22 = vld [vmem:[#allocation2 + $0x18] sm:$0xff]  ;;  %v649_v23 = vld [vmem:[#allocation2 + $0x10] sm:$0xff] }
 0x137   : > { %1542 = vmatpush.bf16.msra.mxu2 %v1511_v2  ;;  %1543 = vmatpush.bf16.msra.mxu3 %v1511_v2  ;;  %v651_v15 = vld [vmem:[#allocation2 + $0x60] sm:$0xff]  ;;  %v659_v19 = vpack.c.bf16 %v648_v14, %v647_v13  ;;  %v645_v24 = vld [vmem:[#allocation2 + $0x8] sm:$0xff]  ;;  %v650_v26 = vld [vmem:[#allocation2 + $0x38] sm:$0xff]  ;;  %v656_v29 = vpack.c.bf16 %v642_v22, %v641_v21 }
 0x138   : > { %v661_v20 = vpack.c.bf16 %v652_v16, %v651_v15  ;;  %v646_v25 = vld [vmem:[#allocation2 + $0x48] sm:$0xff]  ;;  %v653_v27 = vld [vmem:[#allocation2 + $0x78] sm:$0xff]  ;;  %v660_v31 = vpack.c.bf16 %v650_v26, %v649_v23  ;;  %v796_v35 = vld [vmem:[%s2319_s15 + $0x20] sm:$0xff] }
 0x139   : > { %v654_v28 = vld [vmem:[#allocation2 + $0x28] sm:$0xff]  ;;  %v658_v30 = vpack.c.bf16 %v646_v25, %v645_v24  ;;  %v792_v36 = vld [vmem:[%s2319_s15] sm:$0xff]  ;;  %v794_v0 = vld [vmem:[%s2319_s15 + $0x10] sm:$0xff] }
 0x13a   : > { %729 = vmatpush.bf16.msra.mxu0 %v1510_v3  ;;  %1544 = vmatpush.bf16.msra.mxu1 %v1510_v3  ;;  %v662_v32 = vpack.c.bf16 %v654_v28, %v653_v27  ;;  %v800_v43 = vld [vmem:[%s2319_s15 + $0x40] sm:$0xff]  ;;  %v805_v55 = vld [vmem:[%s2319_s15 + $0x68] sm:$0xff]  ;;  %v802_v10 = vld [vmem:[%s2319_s15 + $0x50] sm:$0xff] }
 0x13b   : > { %1545 = vmatpush.bf16.msra.mxu2 %v1510_v3  ;;  %1546 = vmatpush.bf16.msra.mxu3 %v1510_v3  ;;  %v804_v46 = vld [vmem:[%s2319_s15 + $0x60] sm:$0xff]  ;;  %v797_v57 = vld [vmem:[%s2319_s15 + $0x28] sm:$0xff]  ;;  %v798_v11 = vld [vmem:[%s2319_s15 + $0x30] sm:$0xff] }
 0x13c   : > { %v793_v58 = vld [vmem:[%s2319_s15 + $0x8] sm:$0xff]  ;;  %v803_v13 = vld [vmem:[%s2319_s15 + $0x58] sm:$0xff]  ;;  %v806_v22 = vld [vmem:[%s2319_s15 + $0x70] sm:$0xff] }
 0x13d   : > { %v807_v24 = vld [vmem:[%s2319_s15 + $0x78] sm:$0xff] }
 0x13e   : > { %730 = vmatpush.bf16.msra.mxu0 %v1509_v4  ;;  %1547 = vmatpush.bf16.msra.mxu1 %v1509_v4  ;;  %v795_v25 = vld [vmem:[%s2319_s15 + $0x18] sm:$0xff] }
 0x13f   : > { %1548 = vmatpush.bf16.msra.mxu2 %v1509_v4  ;;  %1549 = vmatpush.bf16.msra.mxu3 %v1509_v4  ;;  %v801_v4 = vld [vmem:[%s2319_s15 + $0x48] sm:$0xff] }
 0x142   : > { %731 = vmatpush.bf16.msra.mxu0 %v1508_v5  ;;  %1550 = vmatpush.bf16.msra.mxu1 %v1508_v5 }
 0x143   : > { %1551 = vmatpush.bf16.msra.mxu2 %v1508_v5  ;;  %1552 = vmatpush.bf16.msra.mxu3 %v1508_v5 }
 0x146   : > { %732 = vmatpush.bf16.msra.mxu0 %v1507_v6  ;;  %1553 = vmatpush.bf16.msra.mxu1 %v1507_v6 }
 0x147   : > { %1554 = vmatpush.bf16.msra.mxu2 %v1507_v6  ;;  %1555 = vmatpush.bf16.msra.mxu3 %v1507_v6 }
 0x14a   : > { %733 = vmatpush.bf16.msra.mxu0 %v1506_v7  ;;  %1556 = vmatpush.bf16.msra.mxu1 %v1506_v7 }
 0x14b   : > { %1557 = vmatpush.bf16.msra.mxu2 %v1506_v7  ;;  %1558 = vmatpush.bf16.msra.mxu3 %v1506_v7 }
 0x14e   : > { %734 = vmatpush.bf16.msra.mxu0 %v1505_v8  ;;  %1559 = vmatpush.bf16.msra.mxu1 %v1505_v8 }
 0x14f   : > { %1560 = vmatpush.bf16.msra.mxu2 %v1505_v8  ;;  %1561 = vmatpush.bf16.msra.mxu3 %v1505_v8 }
 0x151   : > { %735 = vmatmul.bf16.vlgmr.msra.gmra.mxu0 %v655_v17  ;;  %745 = vmatmul.bf16.vlgmr.msra.gmra.mxu1 %v657_v18 }
 0x152   : > { %755 = vmatmul.bf16.vlgmr.msra.gmra.mxu2 %v659_v19  ;;  %765 = vmatmul.bf16.vlgmr.msra.gmra.mxu3 %v661_v20 }
 0x161   : > { %740 = vmatmul.bf16.gmra.mxu0 %v656_v29  ;;  %750 = vmatmul.bf16.gmra.mxu1 %v658_v30 }
 0x162   : > { %760 = vmatmul.bf16.gmra.mxu2 %v660_v31  ;;  %770 = vmatmul.bf16.gmra.mxu3 %v662_v32  ;;  %v799_v31 = vld [vmem:[%s2319_s15 + $0x38] sm:$0xff] }
 0x1ce   : > { %v736_v33 = vpop.f32.mrf.mxu0  ;;  %v746_v34 = vpop.f32.mrf.mxu1 }
 0x1cf   : > { %v776_v37 = vmax.f32 %v736_v33, 0.0  ;;  %v780_v38 = vmax.f32 %v746_v34, 0.0  ;;  %v2039_v33 = vmov 128.0  }
 0x1d0   : > { %1719 = vrcp.f32 %v2039_v33 }
 0x1d1   : > { %v2351_v39 = vadd.f32 %v796_v35, %v780_v38  ;;  %v2353_v40 = vadd.f32 %v792_v36, %v776_v37 }
 0x1d3   : > { %832 = vadd.xlane.f32.xlu2 %v2351_v39  ;;  %824 = vadd.xlane.f32.xlu0 %v2353_v40 }
 0x1d5   : > { %v756_v41 = vpop.f32.mrf.mxu2  ;;  %v766_v42 = vpop.f32.mrf.mxu3 }
 0x1d6   : > { %v784_v44 = vmax.f32 %v756_v41, 0.0  ;;  %v788_v45 = vmax.f32 %v766_v42, 0.0  ;;  %v738_v47 = vpop.f32.mrf.mxu0  ;;  %v748_v50 = vpop.f32.mrf.mxu1 }
 0x1d7   : > { %v777_v51 = vmax.f32 %v738_v47, 0.0  ;;  %v781_v52 = vmax.f32 %v748_v50, 0.0  ;;  %v1720_v34 = vpop.eup %1719 }
 0x1d8   : > { %v2359_v48 = vadd.f32 %v800_v43, %v784_v44  ;;  %v2361_v49 = vadd.f32 %v804_v46, %v788_v45  ;;  %v857_v35 = vmul.f32 128.0, %v1720_v34  ;;  %vm861_vm0 = vweird.f32 %v1720_v34 }
 0x1d9   : > { %v2370_v61 = vadd.f32 %v797_v57, %v781_v52  ;;  %v2372_v62 = vadd.f32 %v793_v58, %v777_v51 }
 0x1da   : > { %v858_v36 = vsub.f32 1.0, %v857_v35 }
 0x1db   : > { %840 = vadd.xlane.f32.xlu2 %v2359_v48  ;;  %848 = vadd.xlane.f32.xlu0 %v2361_v49 }
 0x1dc   : > { %v859_v37 = vmul.f32 %v1720_v34, %v858_v36 }
 0x1dd   : > { %v758_v53 = vpop.f32.mrf.mxu2  ;;  %v768_v54 = vpop.f32.mrf.mxu3 }
 0x1de   : > { %v789_v56 = vmax.f32 %v768_v54, 0.0  ;;  %v741_v60 = vpop.f32.mrf.mxu0  ;;  %v785_v1 = vmax.f32 %v758_v53, 0.0  ;;  %v751_v8 = vpop.f32.mrf.mxu1  ;;  %v860_v38 = vadd.f32 %v1720_v34, %v859_v37 }
 0x1df   : > { %v778_v63 = vmax.f32 %v741_v60, 0.0  ;;  %v782_v9 = vmax.f32 %v751_v8, 0.0 }
 0x1e0   : > { %v2368_v59 = vadd.f32 %v805_v55, %v789_v56  ;;  %v2381_v6 = vadd.f32 %v801_v4, %v785_v1  ;;  %v2413_v41 = vsel %vm861_vm0, %v1720_v34, %v860_v38 }
 0x1e1   : > { %v2378_v3 = vadd.f32 %v794_v0, %v778_v63  ;;  %v2390_v16 = vadd.f32 %v798_v11, %v782_v9 }
 0x1e2   : > { %850 = vadd.xlane.f32.xlu1 %v2368_v59 }
 0x1e3   : > { %834 = vadd.xlane.f32.xlu2 %v2370_v61  ;;  %826 = vadd.xlane.f32.xlu0 %v2372_v62 }
 0x1e5   : > { %v761_v2 = vpop.f32.mrf.mxu2  ;;  %v771_v5 = vpop.f32.mrf.mxu3 }
 0x1e6   : > { %v786_v7 = vmax.f32 %v761_v2, 0.0  ;;  %v743_v19 = vpop.f32.mrf.mxu0  ;;  %v790_v20 = vmax.f32 %v771_v5, 0.0  ;;  %v753_v29 = vpop.f32.mrf.mxu1 }
 0x1e7   : > { %v779_v23 = vmax.f32 %v743_v19, 0.0  ;;  %v783_v30 = vmax.f32 %v753_v29, 0.0 }
 0x1e8   : > { %v2388_v15 = vadd.f32 %v802_v10, %v786_v7  ;;  %v2400_v26 = vadd.f32 %v806_v22, %v790_v20 }
 0x1e9   : > { %v2404_v28 = vadd.f32 %v795_v25, %v779_v23  ;;  %v2410_v32 = vadd.f32 %v799_v31, %v783_v30 }
 0x1ea   : > { %828 = vadd.xlane.f32.xlu1 %v2378_v3 }
 0x1eb   : > { %842 = vadd.xlane.f32.xlu0 %v2381_v6 }
 0x1ed   : > { %v763_v12 = vpop.f32.mrf.mxu2  ;;  %v773_v18 = vpop.f32.mrf.mxu3 }
 0x1ee   : > { %v787_v14 = vmax.f32 %v763_v12, 0.0  ;;  %v791_v21 = vmax.f32 %v773_v18, 0.0 }
 0x1f0   : > { %v2392_v17 = vadd.f32 %v803_v13, %v787_v14  ;;  %v2402_v27 = vadd.f32 %v807_v24, %v791_v21 }
 0x1f2   : > { %846 = vadd.xlane.f32.xlu2 %v2392_v17  ;;  %844 = vadd.xlane.f32.xlu1 %v2388_v15 }
 0x1f3   : > { %836 = vadd.xlane.f32.xlu0 %v2390_v16 }
 0x1fa   : > { %852 = vadd.xlane.f32.xlu2 %v2400_v26  ;;  %830 = vadd.xlane.f32.xlu1 %v2404_v28 }
 0x1fb   : > { %854 = vadd.xlane.f32.xlu0 %v2402_v27 }
 0x202   : > { %838 = vadd.xlane.f32.xlu1 %v2410_v32 }
 0x246   : > { %v833_v42 = vpop.xlane.xlu2 %832  ;;  %v825_v43 = vpop.xlane.xlu0 %824 }
 0x247   : > { %v867_v44 = vmul.f32 %v2413_v41, %v833_v42  ;;  %v863_v45 = vmul.f32 %v2413_v41, %v825_v43 }
 0x249   : > { %v2418_v46 = vsub.f32 %v2351_v39, %v867_v44  ;;  %v2421_v47 = vsub.f32 %v2353_v40, %v863_v45 }
 0x24b   : > { %v899_v50 = vmul.f32 %v2418_v46, %v2418_v46  ;;  %v895_v51 = vmul.f32 %v2421_v47, %v2421_v47 }
 0x24d   : > { %919 = vadd.xlane.f32.xlu2 %v899_v50  ;;  %911 = vadd.xlane.f32.xlu1 %v895_v51 }
 0x24e   : > { %v841_v52 = vpop.xlane.xlu2 %840  ;;  %v849_v53 = vpop.xlane.xlu0 %848 }
 0x24f   : > { %v871_v54 = vmul.f32 %v2413_v41, %v841_v52  ;;  %v875_v55 = vmul.f32 %v2413_v41, %v849_v53 }
 0x251   : > { %v2430_v39 = vsub.f32 %v2359_v48, %v871_v54  ;;  %v2433_v40 = vsub.f32 %v2361_v49, %v875_v55 }
 0x253   : > { %v903_v56 = vmul.f32 %v2430_v39, %v2430_v39  ;;  %v907_v57 = vmul.f32 %v2433_v40, %v2433_v40 }
 0x255   : > { %v851_v58 = vpop.xlane.xlu1 %850  ;;  %927 = vadd.xlane.f32.xlu0 %v903_v56  ;;  %935 = vadd.xlane.f32.xlu1 %v907_v57 }
 0x256   : > { %v835_v60 = vpop.xlane.xlu2 %834  ;;  %v827_v63 = vpop.xlane.xlu0 %826  ;;  %v876_v38 = vmul.f32 %v2413_v41, %v851_v58 }
 0x257   : > { %v868_v0 = vmul.f32 %v2413_v41, %v835_v60  ;;  %v864_v1 = vmul.f32 %v2413_v41, %v827_v63 }
 0x258   : > { %v2507_v44 = vsub.f32 %v2368_v59, %v876_v38 }
 0x259   : > { %v2442_v48 = vsub.f32 %v2370_v61, %v868_v0  ;;  %v2445_v49 = vsub.f32 %v2372_v62, %v864_v1 }
 0x25b   : > { %v900_v2 = vmul.f32 %v2442_v48, %v2442_v48  ;;  %v896_v4 = vmul.f32 %v2445_v49, %v2445_v49 }
 0x25d   : > { %v829_v5 = vpop.xlane.xlu1 %828  ;;  %921 = vadd.xlane.f32.xlu0 %v900_v2  ;;  %913 = vadd.xlane.f32.xlu2 %v896_v4 }
 0x25e   : > { %v865_v7 = vmul.f32 %v2413_v41, %v829_v5  ;;  %v843_v8 = vpop.xlane.xlu0 %842 }
 0x25f   : > { %v872_v9 = vmul.f32 %v2413_v41, %v843_v8 }
 0x260   : > { %v2454_v61 = vsub.f32 %v2378_v3, %v865_v7 }
 0x261   : > { %v2457_v62 = vsub.f32 %v2381_v6, %v872_v9 }
 0x262   : > { %v897_v10 = vmul.f32 %v2454_v61, %v2454_v61 }
 0x263   : > { %v904_v11 = vmul.f32 %v2457_v62, %v2457_v62 }
 0x265   : > { %v847_v12 = vpop.xlane.xlu2 %846  ;;  %v845_v13 = vpop.xlane.xlu1 %844  ;;  %915 = vadd.xlane.f32.xlu0 %v897_v10  ;;  %929 = vadd.xlane.f32.xlu1 %v904_v11 }
 0x266   : > { %v874_v14 = vmul.f32 %v2413_v41, %v847_v12  ;;  %v873_v18 = vmul.f32 %v2413_v41, %v845_v13  ;;  %v837_v19 = vpop.xlane.xlu0 %836  ;;  %v2526_v12 = vld [vmem:[%s2802_s7] ss:$0 sm:$0xff] }
 0x267   : > { %v869_v3 = vmul.f32 %v2413_v41, %v837_v19 }
 0x268   : > { %v2467_v6 = vsub.f32 %v2392_v17, %v874_v14  ;;  %v2470_v20 = vsub.f32 %v2388_v15, %v873_v18 }
 0x269   : > { %v2473_v21 = vsub.f32 %v2390_v16, %v869_v3 }
 0x26a   : > { %v905_v22 = vmul.f32 %v2470_v20, %v2470_v20  ;;  %v906_v23 = vmul.f32 %v2467_v6, %v2467_v6 }
 0x26b   : > { %v901_v24 = vmul.f32 %v2473_v21, %v2473_v21 }
 0x26c   : > { %931 = vadd.xlane.f32.xlu2 %v905_v22 }
 0x26d   : > { %v853_v25 = vpop.xlane.xlu2 %852  ;;  %v831_v29 = vpop.xlane.xlu1 %830  ;;  %933 = vadd.xlane.f32.xlu0 %v906_v23  ;;  %923 = vadd.xlane.f32.xlu1 %v901_v24 }
 0x26e   : > { %v877_v15 = vmul.f32 %v2413_v41, %v853_v25  ;;  %v866_v17 = vmul.f32 %v2413_v41, %v831_v29  ;;  %v855_v31 = vpop.xlane.xlu0 %854 }
 0x26f   : > { %v878_v33 = vmul.f32 %v2413_v41, %v855_v31  ;;  %v2539_v31 = vld [vmem:[%s2803_s6] ss:$0 sm:$0xff] }
 0x270   : > { %v2484_v16 = vsub.f32 %v2400_v26, %v877_v15  ;;  %v2487_v30 = vsub.f32 %v2404_v28, %v866_v17 }
 0x271   : > { %v2496_v26 = vsub.f32 %v2402_v27, %v878_v33  ;;  %v908_v27 = vmul.f32 %v2507_v44, %v2507_v44 }
 0x272   : > { %v909_v34 = vmul.f32 %v2484_v16, %v2484_v16  ;;  %v898_v35 = vmul.f32 %v2487_v30, %v2487_v30 }
 0x273   : > { %v910_v43 = vmul.f32 %v2496_v26, %v2496_v26 }
 0x275   : > { %v839_v36 = vpop.xlane.xlu1 %838  ;;  %939 = vadd.xlane.f32.xlu0 %v909_v34  ;;  %917 = vadd.xlane.f32.xlu1 %v898_v35 }
 0x276   : > { %v870_v37 = vmul.f32 %v2413_v41, %v839_v36 }
 0x278   : > { %v2499_v28 = vsub.f32 %v2410_v32, %v870_v37 }
 0x27a   : > { %v902_v42 = vmul.f32 %v2499_v28, %v2499_v28 }
 0x27c   : > { %925 = vadd.xlane.f32.xlu2 %v902_v42 }
 0x27d   : > { %941 = vadd.xlane.f32.xlu1 %v910_v43 }
 0x284   : > { %937 = vadd.xlane.f32.xlu2 %v908_v27 }
 0x2c0   : > { %v920_v45 = vpop.xlane.xlu2 %919  ;;  %v912_v32 = vpop.xlane.xlu1 %911 }
 0x2c1   : > { %v947_v50 = vmul.f32 %v920_v45, %v2413_v41  ;;  %v943_v51 = vmul.f32 %v912_v32, %v2413_v41 }
 0x2c3   : > { %v963_v52 = vadd.f32 1e-05, %v947_v50  ;;  %v959_v53 = vadd.f32 1e-05, %v943_v51 }
 0x2c5   : > { %1721 = vrsqrt.f32 %v963_v52  ;;  %vm1021_vm3 = vweird.f32 %v963_v52  ;;  %vm981_vm5 = vweird.f32 %v959_v53 }
 0x2c6   : > { %1723 = vrsqrt.f32 %v959_v53 }
 0x2c8   : > { %v928_v54 = vpop.xlane.xlu0 %927  ;;  %v936_v55 = vpop.xlane.xlu1 %935 }
 0x2c9   : > { %v951_v56 = vmul.f32 %v928_v54, %v2413_v41  ;;  %v955_v59 = vmul.f32 %v936_v55, %v2413_v41 }
 0x2cb   : > { %v1722_v57 = vpop.eup %1721  ;;  %v2515_v58 = vadd.f32 1e-05, %v951_v56  ;;  %v2517_v60 = vadd.f32 1e-05, %v955_v59 }
 0x2cc   : > { %v1724_v63 = vpop.eup %1723  ;;  %v1016_v0 = vmul.f32 %v1722_v57, %v963_v52  ;;  %vm1022_vm1 = vweird.f32 %v1722_v57 }
 0x2cd   : > { %v976_v1 = vmul.f32 %v1724_v63, %v959_v53  ;;  %1725 = vrsqrt.f32 %v2515_v58  ;;  %vm982_vm2 = vweird.f32 %v1724_v63  ;;  %vm1023_vm4 = vmor %vm1021_vm3, %vm1022_vm1  ;;  %vm1061_vm9 = vweird.f32 %v2515_v58 }
 0x2ce   : > { %v1017_v2 = vmul.f32 %v1722_v57, %v1016_v0  ;;  %1727 = vrsqrt.f32 %v2517_v60  ;;  %vm983_vm6 = vmor %vm981_vm5, %vm982_vm2  ;;  %vm1101_vm11 = vweird.f32 %v2517_v60 }
 0x2cf   : > { %v977_v4 = vmul.f32 %v1724_v63, %v976_v1 }
 0x2d0   : > { %v1018_v5 = vmul.f32 0.5, %v1017_v2  ;;  %v914_v7 = vpop.xlane.xlu2 %913  ;;  %v922_v8 = vpop.xlane.xlu0 %921 }
 0x2d1   : > { %v978_v9 = vmul.f32 0.5, %v977_v4  ;;  %v944_v10 = vmul.f32 %v914_v7, %v2413_v41  ;;  %v948_v11 = vmul.f32 %v922_v8, %v2413_v41 }
 0x2d2   : > { %v1019_v13 = vsub.f32 1.5, %v1018_v5 }
 0x2d3   : > { %v1726_v14 = vpop.eup %1725  ;;  %v979_v18 = vsub.f32 1.5, %v978_v9  ;;  %v2528_v19 = vadd.f32 1e-05, %v944_v10  ;;  %v2530_v3 = vadd.f32 1e-05, %v948_v11 }
 0x2d4   : > { %v1728_v22 = vpop.eup %1727  ;;  %v1020_v23 = vmul.f32 %v1722_v57, %v1019_v13  ;;  %v1056_v24 = vmul.f32 %v1726_v14, %v2515_v58  ;;  %vm1062_vm7 = vweird.f32 %v1726_v14 }
 0x2d5   : > { %v980_v25 = vmul.f32 %v1724_v63, %v979_v18  ;;  %v1096_v29 = vmul.f32 %v1728_v22, %v2517_v60  ;;  %1729 = vrsqrt.f32 %v2528_v19  ;;  %vm1102_vm8 = vweird.f32 %v1728_v22  ;;  %vm1063_vm10 = vmor %vm1061_vm9, %vm1062_vm7 }
 0x2d6   : > { %v1024_v15 = vsel %vm1023_vm4, %v1722_v57, %v1020_v23  ;;  %v1057_v17 = vmul.f32 %v1726_v14, %v1056_v24  ;;  %1731 = vrsqrt.f32 %v2530_v3  ;;  %vm1103_vm12 = vmor %vm1101_vm11, %vm1102_vm8  ;;  %vm991_vm13 = vweird.f32 %v2528_v19 }
 0x2d7   : > { %v1143_v33 = vmul.f32 %v2526_v12, %v1024_v15  ;;  %v984_v34 = vsel %vm983_vm6, %v1724_v63, %v980_v25  ;;  %v1097_v35 = vmul.f32 %v1728_v22, %v1096_v29  ;;  %vm1031_vm1 = vweird.f32 %v2530_v3 }
 0x2d8   : > { %v1139_v36 = vmul.f32 %v2526_v12, %v984_v34  ;;  %v1058_v37 = vmul.f32 0.5, %v1057_v17  ;;  %v916_v38 = vpop.xlane.xlu0 %915  ;;  %v930_v42 = vpop.xlane.xlu1 %929 }
 0x2d9   : > { %v1159_v43 = vmul.f32 %v1143_v33, %v2418_v46  ;;  %v1098_v27 = vmul.f32 0.5, %v1097_v35  ;;  %v945_v45 = vmul.f32 %v916_v38, %v2413_v41  ;;  %v952_v32 = vmul.f32 %v930_v42, %v2413_v41 }
 0x2da   : > { %v1155_v50 = vmul.f32 %v1139_v36, %v2421_v47  ;;  %v1059_v51 = vsub.f32 1.5, %v1058_v37 }
 0x2db   : > { %v1730_v52 = vpop.eup %1729  ;;  %v1179_v53 = vadd.f32 %v2539_v31, %v1159_v43  ;;  %v1099_v54 = vsub.f32 1.5, %v1098_v27  ;;  %v2548_v55 = vadd.f32 1e-05, %v945_v45  ;;  %v2550_v56 = vadd.f32 1e-05, %v952_v32 }
 0x2dc   : > { %v1732_v46 = vpop.eup %1731  ;;  %v1175_v59 = vadd.f32 %v2539_v31, %v1155_v50  ;;  %v1060_v57 = vmul.f32 %v1726_v14, %v1059_v51  ;;  %v986_v47 = vmul.f32 %v1730_v52, %v2528_v19  ;;  %vm992_vm14 = vweird.f32 %v1730_v52 }
 0x2dd   : > { %1195 = vst [vmem:[%s2329_s5 + $0x20] sm:$0xff] %v1179_v53  ;;  %v1100_v63 = vmul.f32 %v1728_v22, %v1099_v54  ;;  %v1026_v0 = vmul.f32 %v1732_v46, %v2530_v3  ;;  %1733 = vrsqrt.f32 %v2548_v55  ;;  %vm1032_vm15 = vweird.f32 %v1732_v46  ;;  %vm993_vm0 = vmor %vm991_vm13, %vm992_vm14 }
 0x2de   : > { %1191 = vst [vmem:[%s2329_s5] sm:$0xff] %v1175_v59  ;;  %v1064_v1 = vsel %vm1063_vm10, %v1726_v14, %v1060_v57  ;;  %v987_v2 = vmul.f32 %v1730_v52, %v986_v47  ;;  %1735 = vrsqrt.f32 %v2550_v56  ;;  %vm1033_vm2 = vmor %vm1031_vm1, %vm1032_vm15  ;;  %vm1001_vm5 = vweird.f32 %v2548_v55 }
 0x2df   : > { %v1147_v58 = vmul.f32 %v2526_v12, %v1064_v1  ;;  %v1104_v4 = vsel %vm1103_vm12, %v1728_v22, %v1100_v63  ;;  %v1027_v5 = vmul.f32 %v1732_v46, %v1026_v0  ;;  %v932_v7 = vpop.xlane.xlu2 %931  ;;  %vm1071_vm7 = vweird.f32 %v2550_v56 }
 0x2e0   : > { %v1151_v8 = vmul.f32 %v2526_v12, %v1104_v4  ;;  %v988_v9 = vmul.f32 0.5, %v987_v2  ;;  %v953_v60 = vmul.f32 %v932_v7, %v2413_v41  ;;  %v934_v10 = vpop.xlane.xlu0 %933  ;;  %v924_v11 = vpop.xlane.xlu1 %923 }
 0x2e1   : > { %v1163_v13 = vmul.f32 %v1147_v58, %v2430_v39  ;;  %v1028_v14 = vmul.f32 0.5, %v1027_v5  ;;  %v954_v18 = vmul.f32 %v934_v10, %v2413_v41  ;;  %v949_v23 = vmul.f32 %v924_v11, %v2413_v41 }
 0x2e2   : > { %v1167_v22 = vmul.f32 %v1151_v8, %v2433_v40  ;;  %v989_v24 = vsub.f32 1.5, %v988_v9  ;;  %v2570_v25 = vadd.f32 1e-05, %v953_v60 }
 0x2e3   : > { %v1734_v29 = vpop.eup %1733  ;;  %v1183_v15 = vadd.f32 %v2539_v31, %v1163_v13  ;;  %v1029_v17 = vsub.f32 1.5, %v1028_v14  ;;  %v2573_v33 = vadd.f32 1e-05, %v954_v18  ;;  %v2577_v37 = vadd.f32 1e-05, %v949_v23 }
 0x2e4   : > { %v1736_v39 = vpop.eup %1735  ;;  %v1187_v34 = vadd.f32 %v2539_v31, %v1167_v22  ;;  %v990_v35 = vmul.f32 %v1730_v52, %v989_v24  ;;  %v996_v36 = vmul.f32 %v1734_v29, %v2548_v55  ;;  %1737 = vrsqrt.f32 %v2570_v25 }
 0x2e5   : > { %1199 = vst [vmem:[%s2329_s5 + $0x40] sm:$0xff] %v1183_v15  ;;  %v1030_v40 = vmul.f32 %v1732_v46, %v1029_v17  ;;  %v1066_v38 = vmul.f32 %v1736_v39, %v2550_v56  ;;  %1739 = vrsqrt.f32 %v2573_v33  ;;  %vm1002_vm3 = vweird.f32 %v1734_v29 }
 0x2e6   : > { %1203 = vst [vmem:[%s2329_s5 + $0x60] sm:$0xff] %v1187_v34  ;;  %v994_v42 = vsel %vm993_vm0, %v1730_v52, %v990_v35  ;;  %v997_v43 = vmul.f32 %v1734_v29, %v996_v36  ;;  %1741 = vrsqrt.f32 %v2577_v37  ;;  %vm1072_vm4 = vweird.f32 %v1736_v39  ;;  %vm1003_vm6 = vmor %vm1001_vm5, %vm1002_vm3 }
 0x2e7   : > { %v1140_v27 = vmul.f32 %v2526_v12, %v994_v42  ;;  %v1034_v45 = vsel %vm1033_vm2, %v1732_v46, %v1030_v40  ;;  %v1067_v32 = vmul.f32 %v1736_v39, %v1066_v38  ;;  %vm1073_vm8 = vmor %vm1071_vm7, %vm1072_vm4  ;;  %vm1081_vm9 = vweird.f32 %v2570_v25 }
 0x2e8   : > { %v1144_v19 = vmul.f32 %v2526_v12, %v1034_v45  ;;  %v998_v50 = vmul.f32 0.5, %v997_v43  ;;  %v940_v3 = vpop.xlane.xlu0 %939  ;;  %v918_v51 = vpop.xlane.xlu1 %917  ;;  %vm1091_vm10 = vweird.f32 %v2573_v33  ;;  %vm1041_vm0 = vweird.f32 %v2577_v37 }
 0x2e9   : > { %v1156_v53 = vmul.f32 %v1140_v27, %v2445_v49  ;;  %v1068_v54 = vmul.f32 0.5, %v1067_v32  ;;  %v957_v52 = vmul.f32 %v940_v3, %v2413_v41  ;;  %v946_v59 = vmul.f32 %v918_v51, %v2413_v41 }
 0x2ea   : > { %v1160_v57 = vmul.f32 %v1144_v19, %v2442_v48  ;;  %v999_v47 = vsub.f32 1.5, %v998_v50  ;;  %v2595_v46 = vpop.eup %1737 }
 0x2eb   : > { %v1176_v63 = vadd.f32 %v2539_v31, %v1156_v53  ;;  %v1069_v0 = vsub.f32 1.5, %v1068_v54  ;;  %v2598_v1 = vadd.f32 1e-05, %v957_v52  ;;  %v2600_v49 = vadd.f32 1e-05, %v946_v59  ;;  %v2602_v2 = vpop.eup %1739 }
 0x2ec   : > { %v1180_v58 = vadd.f32 %v2539_v31, %v1160_v57  ;;  %v1000_v4 = vmul.f32 %v1734_v29, %v999_v47  ;;  %v1076_v48 = vmul.f32 %v2595_v46, %v2570_v25  ;;  %v1086_v7 = vmul.f32 %v2602_v2, %v2573_v33  ;;  %v1742_v8 = vpop.eup %1741 }
 0x2ed   : > { %1192 = vst [vmem:[%s2329_s5 + $0x8] sm:$0xff] %v1176_v63  ;;  %v1070_v5 = vmul.f32 %v1736_v39, %v1069_v0  ;;  %1743 = vrsqrt.f32 %v2598_v1  ;;  %v1036_v56 = vmul.f32 %v1742_v8, %v2577_v37  ;;  %vm1082_vm11 = vweird.f32 %v2595_v46 }
 0x2ee   : > { %1196 = vst [vmem:[%s2329_s5 + $0x28] sm:$0xff] %v1180_v58  ;;  %v1004_v9 = vsel %vm1003_vm6, %v1734_v29, %v1000_v4  ;;  %v1077_v55 = vmul.f32 %v2595_v46, %v1076_v48  ;;  %1745 = vrsqrt.f32 %v2600_v49  ;;  %v1087_v11 = vmul.f32 %v2602_v2, %v1086_v7  ;;  %vm1083_vm13 = vmor %vm1081_vm9, %vm1082_vm11 }
 0x2ef   : > { %v1141_v60 = vmul.f32 %v2526_v12, %v1004_v9  ;;  %v1074_v10 = vsel %vm1073_vm8, %v1736_v39, %v1070_v5  ;;  %v926_v13 = vpop.xlane.xlu2 %925  ;;  %v1037_v24 = vmul.f32 %v1742_v8, %v1036_v56  ;;  %vm1092_vm12 = vweird.f32 %v2602_v2 }
 0x2f0   : > { %v1148_v14 = vmul.f32 %v2526_v12, %v1074_v10  ;;  %v1078_v18 = vmul.f32 0.5, %v1077_v55  ;;  %v1088_v22 = vmul.f32 0.5, %v1087_v11  ;;  %v950_v29 = vmul.f32 %v926_v13, %v2413_v41  ;;  %v942_v15 = vpop.xlane.xlu1 %941  ;;  %vm1093_vm15 = vmor %vm1091_vm10, %vm1092_vm12 }
 0x2f1   : > { %v1157_v23 = vmul.f32 %v1141_v60, %v2454_v61  ;;  %v1038_v40 = vmul.f32 0.5, %v1037_v24  ;;  %v958_v27 = vmul.f32 %v942_v15, %v2413_v41  ;;  %vm1042_vm14 = vweird.f32 %v1742_v8 }
 0x2f2   : > { %v1164_v17 = vmul.f32 %v1148_v14, %v2457_v62  ;;  %v1079_v39 = vsub.f32 1.5, %v1078_v18  ;;  %v1089_v36 = vsub.f32 1.5, %v1088_v22  ;;  %v2629_v61 = vadd.f32 1e-05, %v950_v29  ;;  %vm1043_vm1 = vmor %vm1041_vm0, %vm1042_vm14 }
 0x2f3   : > { %v1744_v34 = vpop.eup %1743  ;;  %v1177_v35 = vadd.f32 %v2539_v31, %v1157_v23  ;;  %v1039_v32 = vsub.f32 1.5, %v1038_v40  ;;  %v974_v47 = vadd.f32 1e-05, %v958_v27  ;;  %vm1121_vm4 = vweird.f32 %v2598_v1 }
 0x2f4   : > { %v1746_v38 = vpop.eup %1745  ;;  %v1184_v42 = vadd.f32 %v2539_v31, %v1164_v17  ;;  %v1080_v43 = vmul.f32 %v2595_v46, %v1079_v39  ;;  %v1116_v62 = vmul.f32 %v1744_v34, %v2598_v1  ;;  %v1090_v45 = vmul.f32 %v2602_v2, %v1089_v36 }
 0x2f5   : > { %1193 = vst [vmem:[%s2329_s5 + $0x10] sm:$0xff] %v1177_v35  ;;  %v1006_v19 = vmul.f32 %v1746_v38, %v2600_v49  ;;  %1747 = vrsqrt.f32 %v2629_v61  ;;  %v1040_v53 = vmul.f32 %v1742_v8, %v1039_v32  ;;  %vm1122_vm2 = vweird.f32 %v1744_v34 }
 0x2f6   : > { %1200 = vst [vmem:[%s2329_s5 + $0x48] sm:$0xff] %v1184_v42  ;;  %v1084_v50 = vsel %vm1083_vm13, %v2595_v46, %v1080_v43  ;;  %v1117_v3 = vmul.f32 %v1744_v34, %v1116_v62  ;;  %v1094_v51 = vsel %vm1093_vm15, %v2602_v2, %v1090_v45  ;;  %1749 = vrsqrt.f32 %v974_v47  ;;  %vm1123_vm5 = vmor %vm1121_vm4, %vm1122_vm2 }
 0x2f7   : > { %v1149_v25 = vmul.f32 %v2526_v12, %v1084_v50  ;;  %v1007_v54 = vmul.f32 %v1746_v38, %v1006_v19  ;;  %v938_v52 = vpop.xlane.xlu2 %937  ;;  %v1150_v59 = vmul.f32 %v2526_v12, %v1094_v51  ;;  %v1044_v37 = vsel %vm1043_vm1, %v1742_v8, %v1040_v53 }
 0x2f8   : > { %v1118_v57 = vmul.f32 0.5, %v1117_v3  ;;  %v956_v33 = vmul.f32 %v938_v52, %v2413_v41  ;;  %v1145_v2 = vmul.f32 %v2526_v12, %v1044_v37  ;;  %vm1012_vm3 = vweird.f32 %v1746_v38 }
 0x2f9   : > { %v1165_v46 = vmul.f32 %v1149_v25, %v2470_v20  ;;  %v1008_v63 = vmul.f32 0.5, %v1007_v54  ;;  %v1166_v0 = vmul.f32 %v1150_v59, %v2467_v6  ;;  %vm1011_vm6 = vweird.f32 %v2600_v49 }
 0x2fa   : > { %v1119_v58 = vsub.f32 1.5, %v1118_v57  ;;  %v972_v5 = vadd.f32 1e-05, %v956_v33  ;;  %v1161_v20 = vmul.f32 %v1145_v2, %v2473_v21  ;;  %vm1013_vm7 = vmor %vm1011_vm6, %vm1012_vm3  ;;  %vm1051_vm9 = vweird.f32 %v2629_v61 }
 0x2fb   : > { %v1185_v4 = vadd.f32 %v2539_v31, %v1165_v46  ;;  %v1009_v48 = vsub.f32 1.5, %v1008_v63  ;;  %v1748_v7 = vpop.eup %1747  ;;  %v1186_v41 = vadd.f32 %v2539_v31, %v1166_v0  ;;  %vm1131_vm12 = vweird.f32 %v974_v47 }
 0x2fc   : > { %v1120_v8 = vmul.f32 %v1744_v34, %v1119_v58  ;;  %v1046_v9 = vmul.f32 %v1748_v7, %v2629_v61  ;;  %1751 = vrsqrt.f32 %v972_v5  ;;  %v1181_v55 = vadd.f32 %v2539_v31, %v1161_v20  ;;  %v1750_v11 = vpop.eup %1749 }
 0x2fd   : > { %1201 = vst [vmem:[%s2329_s5 + $0x50] sm:$0xff] %v1185_v4  ;;  %v1010_v6 = vmul.f32 %v1746_v38, %v1009_v48  ;;  %v1126_v14 = vmul.f32 %v1750_v11, %v974_v47  ;;  %vm1052_vm8 = vweird.f32 %v1748_v7  ;;  %vm1132_vm11 = vweird.f32 %v1750_v11 }
 0x2fe   : > { %1202 = vst [vmem:[%s2329_s5 + $0x58] sm:$0xff] %v1186_v41  ;;  %v1124_v60 = vsel %vm1123_vm5, %v1744_v34, %v1120_v8  ;;  %v1047_v1 = vmul.f32 %v1748_v7, %v1046_v9  ;;  %vm1053_vm10 = vmor %vm1051_vm9, %vm1052_vm8  ;;  %vm1111_vm15 = vweird.f32 %v972_v5 }
 0x2ff   : > { %v1153_v21 = vmul.f32 %v2526_v12, %v1124_v60  ;;  %v1014_v10 = vsel %vm1013_vm7, %v1746_v38, %v1010_v6  ;;  %1197 = vst [vmem:[%s2329_s5 + $0x30] sm:$0xff] %v1181_v55  ;;  %v1127_v29 = vmul.f32 %v1750_v11, %v1126_v14  ;;  %vm1133_vm13 = vmor %vm1131_vm12, %vm1132_vm11 }
 0x300   : > { %v1142_v56 = vmul.f32 %v2526_v12, %v1014_v10  ;;  %v1048_v13 = vmul.f32 0.5, %v1047_v1 }
 0x301   : > { %v1169_v49 = vmul.f32 %v1153_v21, %v2484_v16  ;;  %v1128_v34 = vmul.f32 0.5, %v1127_v29 }
 0x302   : > { %v1158_v18 = vmul.f32 %v1142_v56, %v2487_v30  ;;  %v1752_v23 = vpop.eup %1751  ;;  %v1049_v24 = vsub.f32 1.5, %v1048_v13 }
 0x303   : > { %v1189_v22 = vadd.f32 %v2539_v31, %v1169_v49  ;;  %v1106_v17 = vmul.f32 %v1752_v23, %v972_v5  ;;  %v1129_v36 = vsub.f32 1.5, %v1128_v34  ;;  %vm1112_vm14 = vweird.f32 %v1752_v23 }
 0x304   : > { %v1178_v15 = vadd.f32 %v2539_v31, %v1158_v18  ;;  %v1050_v39 = vmul.f32 %v1748_v7, %v1049_v24  ;;  %vm1113_vm0 = vmor %vm1111_vm15, %vm1112_vm14 }
 0x305   : > { %1205 = vst [vmem:[%s2329_s5 + $0x70] sm:$0xff] %v1189_v22  ;;  %v1107_v16 = vmul.f32 %v1752_v23, %v1106_v17  ;;  %v1130_v38 = vmul.f32 %v1750_v11, %v1129_v36 }
 0x306   : > { %1194 = vst [vmem:[%s2329_s5 + $0x18] sm:$0xff] %v1178_v15  ;;  %v1054_v35 = vsel %vm1053_vm10, %v1748_v7, %v1050_v39 }
 0x307   : > { %v1146_v30 = vmul.f32 %v2526_v12, %v1054_v35  ;;  %v1108_v40 = vmul.f32 0.5, %v1107_v16  ;;  %v1134_v61 = vsel %vm1133_vm13, %v1750_v11, %v1130_v38 }
 0x308   : > { %v1154_v27 = vmul.f32 %v2526_v12, %v1134_v61 }
 0x309   : > { %v1162_v42 = vmul.f32 %v1146_v30, %v2499_v28  ;;  %v1109_v43 = vsub.f32 1.5, %v1108_v40 }
 0x30a   : > { %v1170_v32 = vmul.f32 %v1154_v27, %v2496_v26 }
 0x30b   : > { %v1182_v62 = vadd.f32 %v2539_v31, %v1162_v42  ;;  %v1110_v45 = vmul.f32 %v1752_v23, %v1109_v43 }
 0x30c   : > { %v1190_v28 = vadd.f32 %v2539_v31, %v1170_v32 }
 0x30d   : > { %1198 = vst [vmem:[%s2329_s5 + $0x38] sm:$0xff] %v1182_v62  ;;  %v1114_v19 = vsel %vm1113_vm0, %v1752_v23, %v1110_v45 }
 0x30e   : > { %v1152_v50 = vmul.f32 %v2526_v12, %v1114_v19  ;;  %1206 = vst [vmem:[%s2329_s5 + $0x78] sm:$0xff] %v1190_v28 }
 0x310   : > { %v1168_v3 = vmul.f32 %v1152_v50, %v2507_v44 }
 0x312   : > { %v1188_v25 = vadd.f32 %v2539_v31, %v1168_v3 }
 0x314   : > { %1204 = vst [vmem:[%s2329_s5 + $0x68] sm:$0xff] %v1188_v25 }
 0x315 PF: > { %s2804_s27 = sld [smem:[#allocation19_spill]]  ;;  %s1220_s17 = sshll.u32 %s2329_s5, 4  ;;  %s1221_s17 = int_to_ptr.vmem [resolvable:$true] %s1220_s17 }
 0x316   : > { %s2805_s20 = sld [smem:[#allocation31_spill]]  ;;  %s1208_s8 = scalar_lea.sflag [#allocation5], %s339_s0 }
 0x31b   : > { %s1513_s12 = sshll.u32 %s2804_s27, 7 }
 0x31c   : > { %s1219_s26 = scalar_lea.hbm %s2805_s20, %s1513_s12  ;;  %s1893_s29 = scalar_lea.hbm %s2805_s20, 256 }
 0x31d   : > { %s1222_s4 = sshll.u32 %s1219_s26, 4  ;;  %s1223_s4 = int_to_ptr.hbm [resolvable:$true] %s1222_s4 }
 0x31e   : > { %s1887_s16 = sshra.s32 %s1223_s4, 4  ;;  %s1888_s16 = int_to_ptr.hbm [resolvable:$true] %s1887_s16 }
 0x31f   : > { %s1889_s14 = scalar_lea.hbm %s1888_s16, 128  ;;  %p1894_p0 = scmp.lt.s32.totalorder %s1888_s16, %s2805_s20 }
 0x320   : > { %p1890_p13 = scmp.ne.s32.totalorder %s1888_s16, %s1889_s14  ;;  %p1895_p4 = scmp.lt.s32.totalorder %s1893_s29, %s1889_s14 }
 0x322   : > { %p1891_p2 = pnand %p1890_p13, %p2284_p8  ;;  %p1896_p5 = por %p1895_p4, %p1894_p0 }
 0x324   : > { %p1892_p3 = pneg %p1891_p2 }
 0x326   : > { %p1897_p6 = pnand %p1896_p5, %p1892_p3 }
 0x328   : > { %1900 = shalt.err (!%p1897_p6)
}
 0x329   : > { %s2040_s0 = smov 128   ;;  %s2041_s5 = smov 8  }
 0x32a   : > { %1572 = dma.vmem_to_hbm [thread:$0]  (%p2284_p8), %s1221_s17, 2048, %s1223_s4, %s1208_s8, %s2040_s0, %s2040_s0, %s2041_s5  }
 0x32b PF: > { %p1595_p11 = scmp.ge.s32.totalorder %s2031_s10, 2  ;;  %s1237_s11 = sand.u32 1, %s1979_s21  }
 0x32c   : > { %s1238_s18 = scalar_lea.sflag [#allocation5], %s1237_s11 }
 0x32d   : > { %p1589_p10 = pnand %p1595_p11, %p2288_p7 }
 0x32f   : > { %p1590_p1 = pneg %p1589_p10 }
 0x331   : > { %1974 = dma.done.wait (%p1590_p1), %s1238_s18, 2048  }
 0x332   : > { %1976 = vsyncadd (%p1590_p1), %s1238_s18, 4294965248  ;;  %s26_s10 = sadd.s32 1, %s2031_s10   ;;  %s2807_s1 = sld [smem:[#allocation17_spill]] }
 0x333   : > { %p2710_p9 = scmp.ge.s32.totalorder %s26_s10, 6   ;;  %s2808_s26 = sld [smem:[#allocation24_spill]] }
 0x334   : > { %s2809_s12 = sld [smem:[#allocation18_spill]]  ;;  %s2815_s21 = smov %s1983_s22 }
 0x335   : > { %s2810_s29 = sld [smem:[#allocation25_spill]]  ;;  %s2816_s22 = smov %s1987_s23 }
 0x336   : > { %s2811_s30 = sld [smem:[#allocation20_spill]]  ;;  %s2817_s23 = smov %s2267_s19 }
 0x337   : > { %s2812_s7 = sld [smem:[#allocation21_spill]]  ;;  %s2818_s24 = smov %s1995_s25 }
 0x338   : > { %s2813_s8 = sld [smem:[#allocation22_spill]]  ;;  %s2819_s25 = smov %s2807_s1 }
 0x339   : > { %s2814_s9 = sld [smem:[#allocation23_spill]]  ;;  %s2820_s27 = smov %s2007_s28 }
 0x33a   : > { %s2821_s28 = smov %s2809_s12  ;;  %25 = sbr.rel (!%p2710_p9) target bundleno = 20 (0x14), region = 125 }
 0x33f   :  { %1244 = vsyncpa [#allocation4], 1 }
 0x340   :  { %1246 = vsyncpa [#allocation4 + $0x1], 1 }
 0x341   :  { %1247 = vsyncpa [#allocation7], 1 }
 0x342   :  { %1249 = vsyncpa [#allocation7 + $0x1], 1 }
 0x343   :  { %1250 = vsyncpa [#allocation10], 1 }
 0x344   :  { %1251 = vsyncpa [#allocation5], 1 }
 0x345   :  { %1253 = vsyncpa [#allocation5 + $0x1], 1 }

</bundles_post_ra>
